<compile_context>
chip_gen: v6e
topology: v6e:2x2x1
jax: 0.10.0
libtpu: 0.0.40
codegen_flags: <defaults>
</compile_context>

<pallas_src>
import jax
import jax.numpy as jnp
from jax import lax
from jax.experimental import pallas as pl
from jax.experimental.pallas import tpu as pltpu


def vanilla_forward(image, params):
    """Equivalent of Vanilla.forward(image=image) == student(image)."""
    conv_w = params["conv_w"].astype(jnp.float32)   # (OC, C, K, K)
    conv_b = params["conv_b"].astype(jnp.float32)   # (OC,)
    fc_w = params["fc_w"].astype(jnp.float32)       # (NC, OC)
    fc_b = params["fc_b"].astype(jnp.float32)       # (NC,)

    N, C, H, W = image.shape
    OC, _, K, _ = conv_w.shape
    NC = fc_w.shape[0]
    assert K % 2 == 1, "SAME-padding path assumes odd kernel size"
    P = K // 2

    # ---- layout constants -------------------------------------------------------
    # Per-sample lane-dense layout: zero-pad spatially, flatten (H+2P)*(W+2P) onto the
    # lane axis, add a flat MARGIN so every tap shift stays inside the sample segment.
    Hp, Wp = H + 2 * P, W + 2 * P
    L = Hp * Wp                                     # conv evaluated on all padded positions
    MARGIN = P * Wp + P                             # max |tap shift| in flat index space
    LEXT = ((MARGIN + L + MARGIN + 127) // 128) * 128   # per-sample lane width (mult of 128)
    C_pad = ((C + 7) // 8) * 8                      # full sublanes for tap matmuls

    # ---- batch packing: B_BLK samples per grid step along the lane axis ---------
    B_BLK = min(N, 32)                              # cap keeps mask matrix / VMEM small
    N_pad = ((N + B_BLK - 1) // B_BLK) * B_BLK
    num_blocks = N_pad // B_BLK
    TOTAL = B_BLK * LEXT                            # packed lane width per grid step

    image_b = image.astype(jnp.float32)
    if N_pad != N:
        image_b = jnp.pad(image_b, ((0, N_pad - N), (0, 0), (0, 0), (0, 0)))

    # Host prep (single spatial/channel pad, then margin pad on the flat axis).
    # TODO(synk): collapse into one pad / in-kernel margin fill for large H*W.
    xpad = jnp.pad(image_b, ((0, 0), (0, C_pad - C), (P, P), (P, P)))      # (N_pad, C_pad, Hp, Wp)
    x_ext = jnp.pad(xpad.reshape(N_pad, C_pad, L),
                    ((0, 0), (0, 0), (MARGIN, LEXT - L - MARGIN)))         # (N_pad, C_pad, LEXT)
    x_packed = (x_ext.reshape(num_blocks, B_BLK, C_pad, LEXT)
                     .transpose(0, 2, 1, 3)
                     .reshape(num_blocks, C_pad, TOTAL))                   # samples on lanes

    # Conv taps: tap t = di*K + dj holds conv_w[:, :, di, dj] as an (OC, C_pad) matrix.
    w_taps = jnp.pad(conv_w.transpose(2, 3, 0, 1).reshape(K * K, OC, C),
                     ((0, 0), (0, 0), (0, C_pad - C)))                     # (K*K, OC, C_pad)
    b_col = conv_b.reshape(OC, 1)

    # Block-diagonal mask-column matrix: pooled = y @ m_mat does the masked global
    # average pool as an MXU matmul (1/(H*W) folded in), one column per packed sample.
    interior = jnp.pad(jnp.ones((H, W), jnp.float32), ((P, P), (P, P))).reshape(L)
    col = jnp.zeros((LEXT,), jnp.float32).at[MARGIN:MARGIN + L].set(interior) * (1.0 / (H * W))
    m_mat = jnp.kron(jnp.eye(B_BLK, dtype=jnp.float32), col.reshape(LEXT, 1))   # (TOTAL, B_BLK)

    fc_b_col = fc_b.reshape(NC, 1)

    # Static flat-index shifts of the K*K taps.
    shifts = [(di - P) * Wp + (dj - P) for di in range(K) for dj in range(K)]

    def fused_student_kernel(x_ref, w_ref, b_ref, m_ref, fcw_ref, fcb_ref, o_ref):
        # x_ref:   (C_pad, TOTAL)  B_BLK samples packed on lanes
        # w_ref:   (K*K, OC, C_pad); b_ref: (OC, 1)
        # m_ref:   (TOTAL, B_BLK) block-diagonal interior mask / (H*W)
        # fcw_ref: (NC, OC); fcb_ref: (NC, 1); o_ref: (NC, B_BLK)
        x = x_ref[...]                                                    # (C_pad, TOTAL)
        acc = None
        for t, s in enumerate(shifts):            # static unroll: 9 rolled tap matmuls
            xs = x if s == 0 else pltpu.roll(x, shift=(-s) % TOTAL, axis=1)
            contrib = jnp.dot(w_ref[t], xs, preferred_element_type=jnp.float32)
            acc = contrib if acc is None else acc + contrib               # (OC, TOTAL)
        y = jnp.maximum(acc + b_ref[...], 0.0)                            # bias + ReLU
        pooled = jnp.dot(y, m_ref[...], preferred_element_type=jnp.float32)    # (OC, B_BLK)
        logits = jnp.dot(fcw_ref[...], pooled,
                         preferred_element_type=jnp.float32) + fcb_ref[...]    # (NC, B_BLK)
        o_ref[...] = logits.astype(o_ref.dtype)

    out = pl.pallas_call(
        fused_student_kernel,
        out_shape=jax.ShapeDtypeStruct((num_blocks, NC, B_BLK), jnp.float32),
        grid=(num_blocks,),
        in_specs=[
            pl.BlockSpec((None, C_pad, TOTAL), lambda n: (n, 0, 0)),      # packed activations
            pl.BlockSpec((K * K, OC, C_pad), lambda n: (0, 0, 0)),        # conv taps
            pl.BlockSpec((OC, 1), lambda n: (0, 0)),                      # conv bias
            pl.BlockSpec((TOTAL, B_BLK), lambda n: (0, 0)),               # block-diag pool mask
            pl.BlockSpec((NC, OC), lambda n: (0, 0)),                     # fc weight
            pl.BlockSpec((NC, 1), lambda n: (0, 0)),                      # fc bias
        ],
        out_specs=pl.BlockSpec((None, NC, B_BLK), lambda n: (n, 0, 0)),
        compiler_params=pltpu.CompilerParams(
            dimension_semantics=("parallel",),       # shard sample-blocks across v7x's 2 TCs
            vmem_limit_bytes=32 * 1024 * 1024,       # explicit, safe on v5e/v6e/v7x
        ),
    )(x_packed, w_taps, b_col, m_mat, fc_w, fc_b_col)

    return out.transpose(0, 2, 1).reshape(N_pad, NC)[:N]


def reference_forward(image, params):
    """Pure-JAX reference of the same student (for correctness check)."""
    conv_w, conv_b, fc_w, fc_b = (params["conv_w"], params["conv_b"],
                                  params["fc_w"], params["fc_b"])
    y = lax.conv_general_dilated(
        image, conv_w, window_strides=(1, 1), padding="SAME",
        dimension_numbers=("NCHW", "OIHW", "NCHW"))
    y = jnp.maximum(y + conv_b[None, :, None, None], 0.0)
    pooled = jnp.mean(y, axis=(2, 3))                                     # (N, OC)
    return pooled @ fc_w.T + fc_b[None, :]


if __name__ == "__main__":
    key = jax.random.PRNGKey(0)
    k_img, k_cw, k_cb, k_fw, k_fb = jax.random.split(key, 5)

    N, C, H, W = 2, 4, 16, 16
    OC, K, NUM_CLASSES = 8, 3, 10

    image = jax.random.normal(k_img, (N, C, H, W), dtype=jnp.float32)

    # Deterministic synthetic parameters (shapes match the nn.Module student).
    params = {
        "conv_w": 0.1 * jax.random.normal(k_cw, (OC, C, K, K), dtype=jnp.float32),
        "conv_b": 0.1 * jax.random.normal(k_cb, (OC,), dtype=jnp.float32),
        "fc_w": 0.1 * jax.random.normal(k_fw, (NUM_CLASSES, OC), dtype=jnp.float32),
        "fc_b": 0.1 * jax.random.normal(k_fb, (NUM_CLASSES,), dtype=jnp.float32),
    }

    out = jax.jit(vanilla_forward)(image, params)
    out = jax.block_until_ready(out)

    ref = reference_forward(image, params)
    assert out.shape == (N, NUM_CLASSES)
    assert jnp.allclose(out, ref, atol=1e-4, rtol=1e-4), "mismatch vs JAX reference"

    print("KERNEL_OK")
</pallas_src>

<mosaic_0001>
module attributes {stable_mosaic.version = 11 : i64} {
  func.func @fused_student_kernel(%arg0: i32, %arg1: memref<1x8x768xf32, #tpu.memory_space<vmem>>, %arg2: memref<9x8x8xf32, #tpu.memory_space<vmem>>, %arg3: memref<8x1xf32, #tpu.memory_space<vmem>>, %arg4: memref<768x2xf32, #tpu.memory_space<vmem>>, %arg5: memref<10x8xf32, #tpu.memory_space<vmem>>, %arg6: memref<10x1xf32, #tpu.memory_space<vmem>>, %arg7: memref<1x10x2xf32, #tpu.memory_space<vmem>>) attributes {dimension_semantics = [#tpu.dimension_semantics<parallel>], iteration_bounds = array<i64: 1>, scalar_prefetch = 0 : i64, scratch_operands = 0 : i64, tpu.core_type = #tpu.core_type<tc>, window_params = [{transform_indices = @transform_0, window_bounds = array<i64: 1, 8, 768>}, {pipeline_mode = #tpu.pipeline_mode<synchronous>, transform_indices = @transform_1, window_bounds = array<i64: 9, 8, 8>}, {pipeline_mode = #tpu.pipeline_mode<synchronous>, transform_indices = @transform_2, window_bounds = array<i64: 8, 1>}, {pipeline_mode = #tpu.pipeline_mode<synchronous>, transform_indices = @transform_3, window_bounds = array<i64: 768, 2>}, {pipeline_mode = #tpu.pipeline_mode<synchronous>, transform_indices = @transform_4, window_bounds = array<i64: 10, 8>}, {pipeline_mode = #tpu.pipeline_mode<synchronous>, transform_indices = @transform_5, window_bounds = array<i64: 10, 1>}, {transform_indices = @transform_6, window_bounds = array<i64: 1, 10, 2>}]} {
    %c0 = arith.constant 0 : index
    %c0_0 = arith.constant 0 : index
    %c0_1 = arith.constant 0 : index
    %0 = vector.load %arg1[%c0, %c0_0, %c0_1] : memref<1x8x768xf32, #tpu.memory_space<vmem>>, vector<1x8x768xf32>
    %1 = vector.shape_cast %0 : vector<1x8x768xf32> to vector<8x768xf32>
    %c19_i32 = arith.constant 19 : i32
    %2 = tpu.dynamic_rotate %1 by %c19_i32 dim 1 : vector<8x768xf32>, i32 -> vector<8x768xf32>
    %c0_2 = arith.constant 0 : index
    %c0_3 = arith.constant 0 : index
    %c0_4 = arith.constant 0 : index
    %3 = vector.load %arg2[%c0_2, %c0_3, %c0_4] : memref<9x8x8xf32, #tpu.memory_space<vmem>>, vector<1x8x8xf32>
    %4 = vector.shape_cast %3 : vector<1x8x8xf32> to vector<8x8xf32>
    %cst = arith.constant dense<0.000000e+00> : vector<8x768xf32>
    %5 = tpu.matmul %4, %2, %cst {dimension_numbers = #tpu.dot_dimension_numbers<[1], [0], [0], [1], [0, 0, 1, 1], [], []>} : vector<8x8xf32>, vector<8x768xf32>, vector<8x768xf32> -> vector<8x768xf32>
    %c18_i32 = arith.constant 18 : i32
    %6 = tpu.dynamic_rotate %1 by %c18_i32 dim 1 : vector<8x768xf32>, i32 -> vector<8x768xf32>
    %c1 = arith.constant 1 : index
    %c0_5 = arith.constant 0 : index
    %c0_6 = arith.constant 0 : index
    %7 = vector.load %arg2[%c1, %c0_5, %c0_6] : memref<9x8x8xf32, #tpu.memory_space<vmem>>, vector<1x8x8xf32>
    %8 = vector.shape_cast %7 : vector<1x8x8xf32> to vector<8x8xf32>
    %cst_7 = arith.constant dense<0.000000e+00> : vector<8x768xf32>
    %9 = tpu.matmul %8, %6, %cst_7 {dimension_numbers = #tpu.dot_dimension_numbers<[1], [0], [0], [1], [0, 0, 1, 1], [], []>} : vector<8x8xf32>, vector<8x768xf32>, vector<8x768xf32> -> vector<8x768xf32>
    %10 = arith.addf %5, %9 : vector<8x768xf32>
    %c17_i32 = arith.constant 17 : i32
    %11 = tpu.dynamic_rotate %1 by %c17_i32 dim 1 : vector<8x768xf32>, i32 -> vector<8x768xf32>
    %c2 = arith.constant 2 : index
    %c0_8 = arith.constant 0 : index
    %c0_9 = arith.constant 0 : index
    %12 = vector.load %arg2[%c2, %c0_8, %c0_9] : memref<9x8x8xf32, #tpu.memory_space<vmem>>, vector<1x8x8xf32>
    %13 = vector.shape_cast %12 : vector<1x8x8xf32> to vector<8x8xf32>
    %cst_10 = arith.constant dense<0.000000e+00> : vector<8x768xf32>
    %14 = tpu.matmul %13, %11, %cst_10 {dimension_numbers = #tpu.dot_dimension_numbers<[1], [0], [0], [1], [0, 0, 1, 1], [], []>} : vector<8x8xf32>, vector<8x768xf32>, vector<8x768xf32> -> vector<8x768xf32>
    %15 = arith.addf %10, %14 : vector<8x768xf32>
    %c1_i32 = arith.constant 1 : i32
    %16 = tpu.dynamic_rotate %1 by %c1_i32 dim 1 : vector<8x768xf32>, i32 -> vector<8x768xf32>
    %c3 = arith.constant 3 : index
    %c0_11 = arith.constant 0 : index
    %c0_12 = arith.constant 0 : index
    %17 = vector.load %arg2[%c3, %c0_11, %c0_12] : memref<9x8x8xf32, #tpu.memory_space<vmem>>, vector<1x8x8xf32>
    %18 = vector.shape_cast %17 : vector<1x8x8xf32> to vector<8x8xf32>
    %cst_13 = arith.constant dense<0.000000e+00> : vector<8x768xf32>
    %19 = tpu.matmul %18, %16, %cst_13 {dimension_numbers = #tpu.dot_dimension_numbers<[1], [0], [0], [1], [0, 0, 1, 1], [], []>} : vector<8x8xf32>, vector<8x768xf32>, vector<8x768xf32> -> vector<8x768xf32>
    %20 = arith.addf %15, %19 : vector<8x768xf32>
    %c4 = arith.constant 4 : index
    %c0_14 = arith.constant 0 : index
    %c0_15 = arith.constant 0 : index
    %21 = vector.load %arg2[%c4, %c0_14, %c0_15] : memref<9x8x8xf32, #tpu.memory_space<vmem>>, vector<1x8x8xf32>
    %22 = vector.shape_cast %21 : vector<1x8x8xf32> to vector<8x8xf32>
    %cst_16 = arith.constant dense<0.000000e+00> : vector<8x768xf32>
    %23 = tpu.matmul %22, %1, %cst_16 {dimension_numbers = #tpu.dot_dimension_numbers<[1], [0], [0], [1], [0, 0, 1, 1], [], []>} : vector<8x8xf32>, vector<8x768xf32>, vector<8x768xf32> -> vector<8x768xf32>
    %24 = arith.addf %20, %23 : vector<8x768xf32>
    %c767_i32 = arith.constant 767 : i32
    %25 = tpu.dynamic_rotate %1 by %c767_i32 dim 1 : vector<8x768xf32>, i32 -> vector<8x768xf32>
    %c5 = arith.constant 5 : index
    %c0_17 = arith.constant 0 : index
    %c0_18 = arith.constant 0 : index
    %26 = vector.load %arg2[%c5, %c0_17, %c0_18] : memref<9x8x8xf32, #tpu.memory_space<vmem>>, vector<1x8x8xf32>
    %27 = vector.shape_cast %26 : vector<1x8x8xf32> to vector<8x8xf32>
    %cst_19 = arith.constant dense<0.000000e+00> : vector<8x768xf32>
    %28 = tpu.matmul %27, %25, %cst_19 {dimension_numbers = #tpu.dot_dimension_numbers<[1], [0], [0], [1], [0, 0, 1, 1], [], []>} : vector<8x8xf32>, vector<8x768xf32>, vector<8x768xf32> -> vector<8x768xf32>
    %29 = arith.addf %24, %28 : vector<8x768xf32>
    %c751_i32 = arith.constant 751 : i32
    %30 = tpu.dynamic_rotate %1 by %c751_i32 dim 1 : vector<8x768xf32>, i32 -> vector<8x768xf32>
    %c6 = arith.constant 6 : index
    %c0_20 = arith.constant 0 : index
    %c0_21 = arith.constant 0 : index
    %31 = vector.load %arg2[%c6, %c0_20, %c0_21] : memref<9x8x8xf32, #tpu.memory_space<vmem>>, vector<1x8x8xf32>
    %32 = vector.shape_cast %31 : vector<1x8x8xf32> to vector<8x8xf32>
    %cst_22 = arith.constant dense<0.000000e+00> : vector<8x768xf32>
    %33 = tpu.matmul %32, %30, %cst_22 {dimension_numbers = #tpu.dot_dimension_numbers<[1], [0], [0], [1], [0, 0, 1, 1], [], []>} : vector<8x8xf32>, vector<8x768xf32>, vector<8x768xf32> -> vector<8x768xf32>
    %34 = arith.addf %29, %33 : vector<8x768xf32>
    %c750_i32 = arith.constant 750 : i32
    %35 = tpu.dynamic_rotate %1 by %c750_i32 dim 1 : vector<8x768xf32>, i32 -> vector<8x768xf32>
    %c7 = arith.constant 7 : index
    %c0_23 = arith.constant 0 : index
    %c0_24 = arith.constant 0 : index
    %36 = vector.load %arg2[%c7, %c0_23, %c0_24] : memref<9x8x8xf32, #tpu.memory_space<vmem>>, vector<1x8x8xf32>
    %37 = vector.shape_cast %36 : vector<1x8x8xf32> to vector<8x8xf32>
    %cst_25 = arith.constant dense<0.000000e+00> : vector<8x768xf32>
    %38 = tpu.matmul %37, %35, %cst_25 {dimension_numbers = #tpu.dot_dimension_numbers<[1], [0], [0], [1], [0, 0, 1, 1], [], []>} : vector<8x8xf32>, vector<8x768xf32>, vector<8x768xf32> -> vector<8x768xf32>
    %39 = arith.addf %34, %38 : vector<8x768xf32>
    %c749_i32 = arith.constant 749 : i32
    %40 = tpu.dynamic_rotate %1 by %c749_i32 dim 1 : vector<8x768xf32>, i32 -> vector<8x768xf32>
    %c8 = arith.constant 8 : index
    %c0_26 = arith.constant 0 : index
    %c0_27 = arith.constant 0 : index
    %41 = vector.load %arg2[%c8, %c0_26, %c0_27] : memref<9x8x8xf32, #tpu.memory_space<vmem>>, vector<1x8x8xf32>
    %42 = vector.shape_cast %41 : vector<1x8x8xf32> to vector<8x8xf32>
    %cst_28 = arith.constant dense<0.000000e+00> : vector<8x768xf32>
    %43 = tpu.matmul %42, %40, %cst_28 {dimension_numbers = #tpu.dot_dimension_numbers<[1], [0], [0], [1], [0, 0, 1, 1], [], []>} : vector<8x8xf32>, vector<8x768xf32>, vector<8x768xf32> -> vector<8x768xf32>
    %44 = arith.addf %39, %43 : vector<8x768xf32>
    %c0_29 = arith.constant 0 : index
    %c0_30 = arith.constant 0 : index
    %45 = vector.load %arg3[%c0_29, %c0_30] : memref<8x1xf32, #tpu.memory_space<vmem>>, vector<8x1xf32>
    %46 = vector.broadcast %45 : vector<8x1xf32> to vector<8x768xf32>
    %47 = arith.addf %44, %46 : vector<8x768xf32>
    %cst_31 = arith.constant 0.000000e+00 : f32
    %48 = vector.broadcast %cst_31 : f32 to vector<8x768xf32>
    %49 = arith.maximumf %47, %48 : vector<8x768xf32>
    %c0_32 = arith.constant 0 : index
    %c0_33 = arith.constant 0 : index
    %50 = vector.load %arg4[%c0_32, %c0_33] : memref<768x2xf32, #tpu.memory_space<vmem>>, vector<768x2xf32>
    %cst_34 = arith.constant dense<0.000000e+00> : vector<8x2xf32>
    %51 = tpu.matmul %49, %50, %cst_34 {dimension_numbers = #tpu.dot_dimension_numbers<[1], [0], [0], [1], [0, 0, 1, 1], [], []>} : vector<8x768xf32>, vector<768x2xf32>, vector<8x2xf32> -> vector<8x2xf32>
    %c0_35 = arith.constant 0 : index
    %c0_36 = arith.constant 0 : index
    %52 = vector.load %arg5[%c0_35, %c0_36] : memref<10x8xf32, #tpu.memory_space<vmem>>, vector<10x8xf32>
    %cst_37 = arith.constant dense<0.000000e+00> : vector<10x2xf32>
    %53 = tpu.matmul %52, %51, %cst_37 {dimension_numbers = #tpu.dot_dimension_numbers<[1], [0], [0], [1], [0, 0, 1, 1], [], []>} : vector<10x8xf32>, vector<8x2xf32>, vector<10x2xf32> -> vector<10x2xf32>
    %c0_38 = arith.constant 0 : index
    %c0_39 = arith.constant 0 : index
    %54 = vector.load %arg6[%c0_38, %c0_39] : memref<10x1xf32, #tpu.memory_space<vmem>>, vector<10x1xf32>
    %55 = vector.broadcast %54 : vector<10x1xf32> to vector<10x2xf32>
    %56 = arith.addf %53, %55 : vector<10x2xf32>
    %c0_40 = arith.constant 0 : index
    %c0_41 = arith.constant 0 : index
    %c0_42 = arith.constant 0 : index
    %57 = vector.load %arg7[%c0_40, %c0_41, %c0_42] : memref<1x10x2xf32, #tpu.memory_space<vmem>>, vector<1x10x2xf32>
    %58 = vector.shape_cast %57 : vector<1x10x2xf32> to vector<10x2xf32>
    %59 = vector.shape_cast %56 : vector<10x2xf32> to vector<1x10x2xf32>
    tpu.vector_store %arg7[%c0_40, %c0_41, %c0_42], %59 {strides = array<i32>} : memref<1x10x2xf32, #tpu.memory_space<vmem>>, vector<1x10x2xf32>,
    return
  }
  func.func @transform_0(%arg0: i32) -> (i32, i32, i32) {
    %c0_i32 = arith.constant 0 : i32
    %c0_i32_0 = arith.constant 0 : i32
    %c0_i32_1 = arith.constant 0 : i32
    return %arg0, %c0_i32, %c0_i32_0 : i32, i32, i32
  }
  func.func @transform_1(%arg0: i32) -> (i32, i32, i32) {
    %c0_i32 = arith.constant 0 : i32
    %c0_i32_0 = arith.constant 0 : i32
    %c0_i32_1 = arith.constant 0 : i32
    %c0_i32_2 = arith.constant 0 : i32
    return %c0_i32, %c0_i32_0, %c0_i32_1 : i32, i32, i32
  }
  func.func @transform_2(%arg0: i32) -> (i32, i32) {
    %c0_i32 = arith.constant 0 : i32
    %c0_i32_0 = arith.constant 0 : i32
    %c0_i32_1 = arith.constant 0 : i32
    return %c0_i32, %c0_i32_0 : i32, i32
  }
  func.func @transform_3(%arg0: i32) -> (i32, i32) {
    %c0_i32 = arith.constant 0 : i32
    %c0_i32_0 = arith.constant 0 : i32
    %c0_i32_1 = arith.constant 0 : i32
    return %c0_i32, %c0_i32_0 : i32, i32
  }
  func.func @transform_4(%arg0: i32) -> (i32, i32) {
    %c0_i32 = arith.constant 0 : i32
    %c0_i32_0 = arith.constant 0 : i32
    %c0_i32_1 = arith.constant 0 : i32
    return %c0_i32, %c0_i32_0 : i32, i32
  }
  func.func @transform_5(%arg0: i32) -> (i32, i32) {
    %c0_i32 = arith.constant 0 : i32
    %c0_i32_0 = arith.constant 0 : i32
    %c0_i32_1 = arith.constant 0 : i32
    return %c0_i32, %c0_i32_0 : i32, i32
  }
  func.func @transform_6(%arg0: i32) -> (i32, i32, i32) {
    %c0_i32 = arith.constant 0 : i32
    %c0_i32_0 = arith.constant 0 : i32
    %c0_i32_1 = arith.constant 0 : i32
    return %arg0, %c0_i32, %c0_i32_0 : i32, i32, i32
  }
}

</mosaic_0001>

<bundles_post_ra>
// kernel: vanilla_forward.1
= control target key start
LH: loop header
LB: loop body
LE: loop exit
PB: predicated region body
PF: predicated region fallthrough
CT: control target
= control target key end

     0   :  { %v2776_v2 = vmov 0.0   ;;  %s2777_s25 = smov 18   ;;  %s2778_s10 = smov 19   ;;  %v2785_v7 = vmov 0   ;;  %v41_v9 = vlaneseq  ;;  %vm72_vm1 = vcmask 64512   ;;  %s3438_s0 = inlined_call_operand.vmem [shape: f32[1,8,768], index: 0, kind: input, shape index: {}]   ;;  %s3439_s2 = inlined_call_operand.vmem [shape: f32[8,1], index: 2, kind: input, shape index: {}]   ;;  %s3440_s1 = inlined_call_operand.vmem [shape: f32[9,8,8], index: 1, kind: input, shape index: {}]   ;;  %s3441_s3 = inlined_call_operand.vmem [shape: f32[768,2], index: 3, kind: input, shape index: {}]   ;;  %s3442_s4 = inlined_call_operand.vmem [shape: f32[10,8], index: 4, kind: input, shape index: {}]   ;;  %s3443_s5 = inlined_call_operand.vmem [shape: f32[10,1], index: 5, kind: input, shape index: {}]   ;;  %s3444_s6 = inlined_call_operand.vmem [shape: f32[1,10,2], index: 6, kind: output, shape index: {}]  }
   0x1   :  { %v2824_v0 = vld [vmem:[%s3438_s0 + $0x28] sm:$0xff]  ;;  %v2829_v1 = vld [vmem:[%s3438_s0] sm:$0xff]  ;;  %140 = vmatprep.mubr.f32.mxu0 %v2776_v2  ;;  %664 = vmatprep.mubr.f32.mxu1 %v2776_v2  ;;  %v2838_v3 = vld [vmem:[%s3438_s0 + $0x10] sm:$0xff]  ;;  %s2779_s11 = smov 17   ;;  %s2781_s12 = smov 127   ;;  %vm2608_vm9 = vcmask 9216  }
   0x2   :  { %61 = vrot.lane.b32.xlu1 %v2824_v0, %s2777_s25  ;;  %51 = vrot.lane.b32.xlu0 %v2829_v1, %s2777_s25  ;;  %v2843_v4 = vld [vmem:[%s3438_s0 + $0x8] sm:$0xff]  ;;  %v2850_v5 = vld [vmem:[%s3438_s0 + $0x20] sm:$0xff]  ;;  %s2782_s13 = smov 111   ;;  %s2783_s14 = smov 110   ;;  %v2904_v10 = vand.u32 127, %v41_v9  ;;  %vm2606_vm10 = vcmask 15360  }
   0x3   :  { %v2855_v6 = vld [vmem:[%s3438_s0 + $0x18] sm:$0xff]  ;;  %s2780_s0 = smov 1   ;;  %s2784_s15 = smov 109   ;;  %2774 = vset.pattern.permute.xlu0 %v2785_v7  ;;  %2775 = vset.pattern.permute.xlu1 %v2785_v7  ;;  %v2187_v8 = vld [vmem:[%s3439_s2] sm:$0xff]  ;;  %v2614_v16 = vld [vmem:[%s3440_s1 + $0x8] sm:$0xff] }
   0x4   :  { %vm63_vm0 = vcmp.lt.s32.totalorder %v2904_v10, 18  ;;  %vm43_vm2 = vcmp.lt.s32.totalorder %v2904_v10, 19  ;;  %v50_v30 = vld [vmem:[%s3440_s1] sm:$0xff]  ;;  %vm517_vm3 = vcmp.lt.s32.totalorder %v2904_v10, 17  ;;  %v2621_v44 = vld [vmem:[%s3440_s1 + $0x10] sm:$0xff]  ;;  %vm760_vm4 = vcmp.lt.s32.totalorder %v2904_v10, 1 }
   0x5   :  { %v2625_v55 = vld [vmem:[%s3440_s1 + $0x18] sm:$0xff]  ;;  %v2629_v62 = vld [vmem:[%s3440_s1 + $0x20] sm:$0xff]  ;;  %vm1227_vm5 = vcmp.lt.s32.totalorder %v2904_v10, 127  ;;  %vm1470_vm6 = vcmp.lt.s32.totalorder %v2904_v10, 111  ;;  %vm1713_vm7 = vcmp.lt.s32.totalorder %v2904_v10, 110  ;;  %vm1956_vm8 = vcmp.lt.s32.totalorder %v2904_v10, 109 }
   0x6   :  { %55 = vrot.lane.b32.xlu1 %v2838_v3, %s2777_s25  ;;  %53 = vrot.lane.b32.xlu0 %v2843_v4, %s2777_s25  ;;  %v2235_v10 = vld [vmem:[%s3441_s3 + $0xf0] sm:$0xff] }
   0xa   :  { %59 = vrot.lane.b32.xlu1 %v2850_v5, %s2777_s25  ;;  %57 = vrot.lane.b32.xlu0 %v2855_v6, %s2777_s25 }
   0xe   :  { %31 = vrot.lane.b32.xlu1 %v2843_v4, %s2778_s10  ;;  %29 = vrot.lane.b32.xlu0 %v2829_v1, %s2778_s10 }
  0x12   :  { %33 = vrot.lane.b32.xlu1 %v2838_v3, %s2778_s10  ;;  %39 = vrot.lane.b32.xlu0 %v2824_v0, %s2778_s10 }
  0x16   :  { %37 = vrot.lane.b32.xlu1 %v2850_v5, %s2778_s10  ;;  %35 = vrot.lane.b32.xlu0 %v2855_v6, %s2778_s10 }
  0x1a   :  { %507 = vrot.lane.b32.xlu1 %v2843_v4, %s2779_s11  ;;  %505 = vrot.lane.b32.xlu0 %v2829_v1, %s2779_s11 }
  0x1e   :  { %513 = vrot.lane.b32.xlu1 %v2850_v5, %s2779_s11  ;;  %515 = vrot.lane.b32.xlu0 %v2824_v0, %s2779_s11 }
  0x22   :  { %509 = vrot.lane.b32.xlu1 %v2838_v3, %s2779_s11  ;;  %511 = vrot.lane.b32.xlu0 %v2855_v6, %s2779_s11 }
  0x26   :  { %754 = vrot.lane.b32.xlu1 %v2855_v6, %s2780_s0  ;;  %752 = vrot.lane.b32.xlu0 %v2838_v3, %s2780_s0 }
  0x2a   :  { %748 = vrot.lane.b32.xlu1 %v2829_v1, %s2780_s0  ;;  %750 = vrot.lane.b32.xlu0 %v2843_v4, %s2780_s0 }
  0x2e   :  { %756 = vrot.lane.b32.xlu1 %v2850_v5, %s2780_s0  ;;  %758 = vrot.lane.b32.xlu0 %v2824_v0, %s2780_s0 }
  0x32   :  { %1223 = vrot.lane.b32.xlu1 %v2850_v5, %s2781_s12  ;;  %1221 = vrot.lane.b32.xlu0 %v2855_v6, %s2781_s12 }
  0x36   :  { %1217 = vrot.lane.b32.xlu1 %v2843_v4, %s2781_s12  ;;  %1219 = vrot.lane.b32.xlu0 %v2838_v3, %s2781_s12 }
  0x3a   :  { %1460 = vrot.lane.b32.xlu1 %v2843_v4, %s2782_s13  ;;  %1215 = vrot.lane.b32.xlu0 %v2829_v1, %s2781_s12 }
  0x3e   :  { %1458 = vrot.lane.b32.xlu1 %v2829_v1, %s2782_s13  ;;  %1462 = vrot.lane.b32.xlu0 %v2838_v3, %s2782_s13 }
  0x42   :  { %1468 = vrot.lane.b32.xlu1 %v2824_v0, %s2782_s13  ;;  %1225 = vrot.lane.b32.xlu0 %v2824_v0, %s2781_s12 }
  0x46   :  { %1464 = vrot.lane.b32.xlu1 %v2855_v6, %s2782_s13  ;;  %1466 = vrot.lane.b32.xlu0 %v2850_v5, %s2782_s13 }
  0x4a   :  { %1709 = vrot.lane.b32.xlu1 %v2850_v5, %s2783_s14  ;;  %1707 = vrot.lane.b32.xlu0 %v2855_v6, %s2783_s14 }
  0x4e   :  { %1703 = vrot.lane.b32.xlu1 %v2843_v4, %s2783_s14  ;;  %1705 = vrot.lane.b32.xlu0 %v2838_v3, %s2783_s14 }
  0x52   :  { %1946 = vrot.lane.b32.xlu1 %v2843_v4, %s2784_s15  ;;  %1701 = vrot.lane.b32.xlu0 %v2829_v1, %s2783_s14 }
  0x56   :  { %1944 = vrot.lane.b32.xlu1 %v2829_v1, %s2784_s15  ;;  %1948 = vrot.lane.b32.xlu0 %v2838_v3, %s2784_s15 }
  0x5a   :  { %1950 = vrot.lane.b32.xlu1 %v2855_v6, %s2784_s15  ;;  %1711 = vrot.lane.b32.xlu0 %v2824_v0, %s2783_s14 }
  0x5e   :  { %1954 = vrot.lane.b32.xlu1 %v2824_v0, %s2784_s15  ;;  %1952 = vrot.lane.b32.xlu0 %v2850_v5, %s2784_s15 }
  0x62   :  { %2190 = vperm.xlu0 %2774, %v2187_v8  }
  0x74   :  { %v62_v11 = vpop.permute.xlu1 %61  ;;  %v52_v12 = vpop.permute.xlu0 %51 }
  0x75   :  { %v69_v17 = vsel %vm63_vm0, %v62_v11, %v52_v12 }
  0x78   :  { %v56_v13 = vpop.permute.xlu1 %55  ;;  %v54_v14 = vpop.permute.xlu0 %53 }
  0x79   :  { %v68_v15 = vsel %vm63_vm0, %v52_v12, %v54_v14  ;;  %v67_v21 = vsel %vm63_vm0, %v54_v14, %v56_v13 }
  0x7a   :  { %106 = vmatprep.subr.mxu0 %v68_v15 }
  0x7b   :  { %107 = vmatpush1.msra.mxu0 %v69_v17  ;;  %v2637_v17 = vld [vmem:[%s3440_s1 + $0x30] sm:$0xff] }
  0x7c   :  { %v60_v18 = vpop.permute.xlu1 %59  ;;  %2615 = vmatmul.mubr.msk.f32.vlgmr.msra.gmra.mxu0 %vm72_vm1, %v2614_v16  ;;  %v58_v19 = vpop.permute.xlu0 %57 }
  0x7d   :  { %v66_v20 = vsel %vm63_vm0, %v56_v13, %v58_v19  ;;  %211 = vmatprep.mubr.f32.mxu0 %v2776_v2  ;;  %v64_v22 = vsel %vm63_vm0, %v60_v18, %v62_v11  ;;  %v65_v23 = vsel %vm63_vm0, %v58_v19, %v60_v18 }
  0x7e   :  { %177 = vmatprep.subr.mxu0 %v66_v20 }
  0x7f   :  { %178 = vmatpush1.msra.mxu0 %v67_v21 }
  0x80   :  { %v32_v24 = vpop.permute.xlu1 %31  ;;  %2616 = vmatmul.mubr.msk.f32.vlgmr.msra.gmra.mxu0 %vm72_vm1, %v2614_v16  ;;  %248 = vmatprep.subr.mxu0 %v64_v22  ;;  %v30_v25 = vpop.permute.xlu0 %29 }
  0x81   :  { %249 = vmatpush1.msra.mxu0 %v65_v23  ;;  %v48_v26 = vsel %vm43_vm2, %v30_v25, %v32_v24  ;;  %282 = vmatprep.mubr.f32.mxu0 %v2776_v2 }
  0x82   :  { %322 = vmatprep.subr.mxu0 %v48_v26 }
  0x84   :  { %v34_v27 = vpop.permute.xlu1 %33  ;;  %2617 = vmatmul.mubr.msk.f32.vlgmr.msra.gmra.mxu0 %vm72_vm1, %v2614_v16  ;;  %v40_v28 = vpop.permute.xlu0 %39 }
  0x85   :  { %v49_v29 = vsel %vm43_vm2, %v40_v28, %v30_v25  ;;  %356 = vmatprep.mubr.f32.mxu0 %v2776_v2  ;;  %v47_v34 = vsel %vm43_vm2, %v32_v24, %v34_v27 }
  0x86   :  { %323 = vmatpush1.msra.mxu0 %v49_v29 }
  0x88   :  { %v38_v31 = vpop.permute.xlu1 %37  ;;  %2618 = vmatmul.mubr.msk.f32.vlgmr.msra.gmra.mxu0 %vm72_vm1, %v50_v30  ;;  %v36_v32 = vpop.permute.xlu0 %35 }
  0x89   :  { %v46_v33 = vsel %vm43_vm2, %v34_v27, %v36_v32  ;;  %427 = vmatprep.mubr.f32.mxu0 %v2776_v2  ;;  %v44_v35 = vsel %vm43_vm2, %v38_v31, %v40_v28  ;;  %v45_v36 = vsel %vm43_vm2, %v36_v32, %v38_v31 }
  0x8a   :  { %393 = vmatprep.subr.mxu0 %v46_v33  ;;  %v2641_v33 = vld [vmem:[%s3440_s1 + $0x38] sm:$0xff] }
  0x8b   :  { %394 = vmatpush1.msra.mxu0 %v47_v34 }
  0x8c   :  { %v508_v37 = vpop.permute.xlu1 %507  ;;  %2619 = vmatmul.mubr.msk.f32.vlgmr.msra.gmra.mxu0 %vm72_vm1, %v50_v30  ;;  %464 = vmatprep.subr.mxu0 %v44_v35  ;;  %v506_v38 = vpop.permute.xlu0 %505 }
  0x8d   :  { %465 = vmatpush1.msra.mxu0 %v45_v36  ;;  %v522_v39 = vsel %vm517_vm3, %v506_v38, %v508_v37  ;;  %498 = vmatprep.mubr.f32.mxu0 %v2776_v2 }
  0x8e   :  { %559 = vmatprep.subr.mxu0 %v522_v39 }
  0x90   :  { %v514_v40 = vpop.permute.xlu1 %513  ;;  %2620 = vmatmul.mubr.msk.f32.vlgmr.msra.gmra.mxu0 %vm72_vm1, %v50_v30  ;;  %v516_v41 = vpop.permute.xlu0 %515 }
  0x91   :  { %v523_v42 = vsel %vm517_vm3, %v516_v41, %v506_v38  ;;  %593 = vmatprep.mubr.f32.mxu0 %v2776_v2  ;;  %v518_v43 = vsel %vm517_vm3, %v514_v40, %v516_v41 }
  0x92   :  { %560 = vmatpush1.msra.mxu0 %v523_v42 }
  0x93   :  { %701 = vmatprep.subr.mxu0 %v518_v43  ;;  %v2645_v43 = vld [vmem:[%s3440_s1 + $0x40] sm:$0xff] }
  0x94   :  { %v510_v45 = vpop.permute.xlu1 %509  ;;  %2622 = vmatmul.mubr.msk.f32.vlgmr.msra.gmra.mxu0 %vm72_vm1, %v2621_v44  ;;  %v512_v46 = vpop.permute.xlu0 %511 }
  0x95   :  { %v519_v47 = vsel %vm517_vm3, %v512_v46, %v514_v40  ;;  %v520_v48 = vsel %vm517_vm3, %v510_v45, %v512_v46  ;;  %v521_v49 = vsel %vm517_vm3, %v508_v37, %v510_v45  ;;  %735 = vmatprep.mubr.f32.mxu0 %v2776_v2 }
  0x96   :  { %630 = vmatprep.subr.mxu1 %v520_v48  ;;  %702 = vmatpush1.msra.mxu0 %v519_v47 }
  0x97   :  { %631 = vmatpush1.msra.mxu1 %v521_v49 }
  0x98   :  { %v755_v50 = vpop.permute.xlu1 %754  ;;  %2623 = vmatmul.mubr.msk.f32.vlgmr.msra.gmra.mxu1 %vm72_vm1, %v2621_v44  ;;  %2624 = vmatmul.mubr.msk.f32.vlgmr.msra.gmra.mxu0 %vm72_vm1, %v2621_v44  ;;  %v753_v51 = vpop.permute.xlu0 %752 }
  0x99   :  { %v763_v52 = vsel %vm760_vm4, %v753_v51, %v755_v50  ;;  %907 = vmatprep.mubr.f32.mxu0 %v2776_v2  ;;  %836 = vmatprep.mubr.f32.mxu1 %v2776_v2 }
  0x9a   :  { %873 = vmatprep.subr.mxu0 %v763_v52 }
  0x9c   :  { %v749_v53 = vpop.permute.xlu1 %748  ;;  %v751_v54 = vpop.permute.xlu0 %750 }
  0x9d   :  { %v764_v56 = vsel %vm760_vm4, %v751_v54, %v753_v51  ;;  %v765_v57 = vsel %vm760_vm4, %v749_v53, %v751_v54  ;;  %v2236_v54 = vld [vmem:[%s3441_s3 + $0xf8] sm:$0xff] }
  0x9e   :  { %802 = vmatprep.subr.mxu1 %v765_v57  ;;  %874 = vmatpush1.msra.mxu0 %v764_v56  ;;  %v2234_v56 = vld [vmem:[%s3441_s3 + $0xe8] sm:$0xff] }
  0x9f   :  { %2627 = vmatmul.mubr.msk.f32.vlgmr.msra.gmra.mxu0 %vm72_vm1, %v2625_v55  ;;  %1026 = vmatprep.subr.mxu0 %v2843_v4  ;;  %v2218_v57 = vld [vmem:[%s3441_s3 + $0x68] sm:$0xff] }
  0xa0   :  { %v757_v58 = vpop.permute.xlu1 %756  ;;  %v759_v59 = vpop.permute.xlu0 %758  ;;  %1027 = vmatpush1.msra.mxu0 %v2829_v1  ;;  %1060 = vmatprep.mubr.f32.mxu0 %v2776_v2 }
  0xa1   :  { %v766_v60 = vsel %vm760_vm4, %v759_v59, %v749_v53  ;;  %v761_v61 = vsel %vm760_vm4, %v757_v58, %v759_v59  ;;  %1168 = vmatprep.subr.mxu0 %v2824_v0  ;;  %v762_v63 = vsel %vm760_vm4, %v755_v50, %v757_v58  ;;  %v2233_v58 = vld [vmem:[%s3441_s3 + $0xe0] sm:$0xff] }
  0xa2   :  { %803 = vmatpush1.msra.mxu1 %v766_v60  ;;  %v2217_v59 = vld [vmem:[%s3441_s3 + $0x60] sm:$0xff]  ;;  %v2232_v60 = vld [vmem:[%s3441_s3 + $0xd8] sm:$0xff] }
  0xa3   :  { %2626 = vmatmul.mubr.msk.f32.vlgmr.msra.gmra.mxu1 %vm72_vm1, %v2625_v55  ;;  %944 = vmatprep.subr.mxu1 %v761_v61  ;;  %v2216_v61 = vld [vmem:[%s3441_s3 + $0x58] sm:$0xff] }
  0xa4   :  { %v1224_v1 = vpop.permute.xlu1 %1223  ;;  %945 = vmatpush1.msra.mxu1 %v762_v63  ;;  %v1222_v4 = vpop.permute.xlu0 %1221  ;;  %2630 = vmatmul.mubr.msk.f32.vlgmr.msra.gmra.mxu0 %vm72_vm1, %v2629_v62  ;;  %v2231_v63 = vld [vmem:[%s3441_s3 + $0xd0] sm:$0xff] }
  0xa5   :  { %1169 = vmatpush1.msra.mxu0 %v2850_v5  ;;  %978 = vmatprep.mubr.f32.mxu1 %v2776_v2  ;;  %v1229_v0 = vsel %vm1227_vm5, %v1222_v4, %v1224_v1 }
  0xa6   :  { %1340 = vmatprep.subr.mxu0 %v1229_v0  ;;  %1097 = vmatprep.subr.mxu1 %v2855_v6  ;;  %v2633_v6 = vld [vmem:[%s3440_s1 + $0x28] sm:$0xff]  ;;  %v2267_v0 = vld [vmem:[%s3441_s3 + $0x1f0] sm:$0xff] }
  0xa7   :  { %2628 = vmatmul.mubr.msk.f32.vlgmr.msra.gmra.mxu1 %vm72_vm1, %v2625_v55  ;;  %1202 = vmatprep.mubr.f32.mxu0 %v2776_v2  ;;  %v2219_v55 = vld [vmem:[%s3441_s3 + $0x70] sm:$0xff] }
  0xa8   :  { %v1218_v7 = vpop.permute.xlu1 %1217  ;;  %v1220_v8 = vpop.permute.xlu0 %1219  ;;  %1098 = vmatpush1.msra.mxu1 %v2838_v3  ;;  %2632 = vmatmul.mubr.msk.f32.vlgmr.msra.gmra.mxu0 %vm72_vm1, %v2629_v62 }
  0xa9   :  { %v1230_v5 = vsel %vm1227_vm5, %v1220_v8, %v1222_v4  ;;  %1131 = vmatprep.mubr.f32.mxu1 %v2776_v2  ;;  %v1231_v9 = vsel %vm1227_vm5, %v1218_v7, %v1220_v8  ;;  %1374 = vmatprep.mubr.f32.mxu0 %v2776_v2  ;;  %v2215_v4 = vld [vmem:[%s3441_s3 + $0x50] sm:$0xff] }
  0xaa   :  { %1269 = vmatprep.subr.mxu1 %v1231_v9  ;;  %1341 = vmatpush1.msra.mxu0 %v1230_v5  ;;  %v2251_v8 = vld [vmem:[%s3441_s3 + $0x170] sm:$0xff]  ;;  %v2214_v5 = vld [vmem:[%s3441_s3 + $0x48] sm:$0xff] }
  0xab   :  { %2631 = vmatmul.mubr.msk.f32.vlgmr.msra.gmra.mxu1 %vm72_vm1, %v2629_v62  ;;  %v2268_v62 = vld [vmem:[%s3441_s3 + $0x1f8] sm:$0xff]  ;;  %v2266_v9 = vld [vmem:[%s3441_s3 + $0x1e8] sm:$0xff] }
  0xac   :  { %v1461_v3 = vpop.permute.xlu1 %1460  ;;  %v1216_v11 = vpop.permute.xlu0 %1215  ;;  %2635 = vmatmul.mubr.msk.f32.vlgmr.msra.gmra.mxu0 %vm72_vm1, %v2633_v6  ;;  %1303 = vmatprep.mubr.f32.mxu1 %v2776_v2 }
  0xad   :  { %v1232_v12 = vsel %vm1227_vm5, %v1216_v11, %v1218_v7  ;;  %1546 = vmatprep.mubr.f32.mxu0 %v2776_v2  ;;  %v2230_v7 = vld [vmem:[%s3441_s3 + $0xc8] sm:$0xff] }
  0xae   :  { %1270 = vmatpush1.msra.mxu1 %v1232_v12  ;;  %v2265_v12 = vld [vmem:[%s3441_s3 + $0x1e0] sm:$0xff] }
  0xaf   :  { %2634 = vmatmul.mubr.msk.f32.vlgmr.msra.gmra.mxu1 %vm72_vm1, %v2633_v6 }
  0xb0   :  { %v1459_v13 = vpop.permute.xlu1 %1458  ;;  %v1463_v14 = vpop.permute.xlu0 %1462  ;;  %1445 = vmatprep.mubr.f32.mxu1 %v2776_v2 }
  0xb1   :  { %v1475_v15 = vsel %vm1470_vm6, %v1459_v13, %v1461_v3  ;;  %v1474_v16 = vsel %vm1470_vm6, %v1461_v3, %v1463_v14  ;;  %v2250_v3 = vld [vmem:[%s3441_s3 + $0x168] sm:$0xff] }
  0xb2   :  { %1512 = vmatprep.subr.mxu0 %v1474_v16  ;;  %v2264_v16 = vld [vmem:[%s3441_s3 + $0x1d8] sm:$0xff] }
  0xb3   :  { %1513 = vmatpush1.msra.mxu0 %v1475_v15  ;;  %v2212_v15 = vld [vmem:[%s3441_s3 + $0x38] sm:$0xff] }
  0xb4   :  { %v1469_v18 = vpop.permute.xlu1 %1468  ;;  %2638 = vmatmul.mubr.msk.f32.vlgmr.msra.gmra.mxu0 %vm72_vm1, %v2637_v17  ;;  %v1226_v19 = vpop.permute.xlu0 %1225 }
  0xb5   :  { %v1228_v20 = vsel %vm1227_vm5, %v1224_v1, %v1226_v19  ;;  %v1233_v21 = vsel %vm1227_vm5, %v1226_v19, %v1216_v11  ;;  %v1476_v22 = vsel %vm1470_vm6, %v1469_v18, %v1459_v13  ;;  %1688 = vmatprep.mubr.f32.mxu0 %v2776_v2  ;;  %v2252_v1 = vld [vmem:[%s3441_s3 + $0x178] sm:$0xff]  ;;  %v2213_v11 = vld [vmem:[%s3441_s3 + $0x40] sm:$0xff]  ;;  %v2211_v19 = vld [vmem:[%s3441_s3 + $0x30] sm:$0xff] }
  0xb6   :  { %1411 = vmatprep.subr.mxu1 %v1233_v21  ;;  %1654 = vmatprep.subr.mxu0 %v1476_v22  ;;  %v2228_v13 = vld [vmem:[%s3441_s3 + $0xb8] sm:$0xff]  ;;  %v2226_v21 = vld [vmem:[%s3441_s3 + $0xa8] sm:$0xff]  ;;  %v2247_v22 = vld [vmem:[%s3441_s3 + $0x150] sm:$0xff] }
  0xb7   :  { %1412 = vmatpush1.msra.mxu1 %v1228_v20  ;;  %v2263_v20 = vld [vmem:[%s3441_s3 + $0x1d0] sm:$0xff] }
  0xb8   :  { %v1465_v23 = vpop.permute.xlu1 %1464  ;;  %2636 = vmatmul.mubr.msk.f32.vlgmr.msra.gmra.mxu1 %vm72_vm1, %v2633_v6  ;;  %v1467_v24 = vpop.permute.xlu0 %1466  ;;  %v2229_v6 = vld [vmem:[%s3441_s3 + $0xc0] sm:$0xff] }
  0xb9   :  { %v1473_v25 = vsel %vm1470_vm6, %v1463_v14, %v1465_v23  ;;  %v1471_v26 = vsel %vm1470_vm6, %v1467_v24, %v1469_v18  ;;  %v1472_v27 = vsel %vm1470_vm6, %v1465_v23, %v1467_v24  ;;  %1617 = vmatprep.mubr.f32.mxu1 %v2776_v2  ;;  %v2249_v14 = vld [vmem:[%s3441_s3 + $0x160] sm:$0xff]  ;;  %v2248_v18 = vld [vmem:[%s3441_s3 + $0x158] sm:$0xff]  ;;  %v2210_v23 = vld [vmem:[%s3441_s3 + $0x28] sm:$0xff] }
  0xba   :  { %1583 = vmatprep.subr.mxu1 %v1472_v27  ;;  %1655 = vmatpush1.msra.mxu0 %v1471_v26  ;;  %v2262_v24 = vld [vmem:[%s3441_s3 + $0x1c8] sm:$0xff]  ;;  %v2209_v27 = vld [vmem:[%s3441_s3 + $0x20] sm:$0xff] }
  0xbb   :  { %1584 = vmatpush1.msra.mxu1 %v1473_v25  ;;  %2640 = vmatmul.mubr.msk.f32.vlgmr.msra.gmra.mxu0 %vm72_vm1, %v2637_v17  ;;  %v2225_v25 = vld [vmem:[%s3441_s3 + $0xa0] sm:$0xff]  ;;  %v2246_v26 = vld [vmem:[%s3441_s3 + $0x148] sm:$0xff] }
  0xbc   :  { %v1710_v28 = vpop.permute.xlu1 %1709  ;;  %2639 = vmatmul.mubr.msk.f32.vlgmr.msra.gmra.mxu1 %vm72_vm1, %v2637_v17  ;;  %v1708_v29 = vpop.permute.xlu0 %1707  ;;  %1860 = vmatprep.mubr.f32.mxu0 %v2776_v2  ;;  %v2227_v17 = vld [vmem:[%s3441_s3 + $0xb0] sm:$0xff] }
  0xbd   :  { %v1715_v30 = vsel %vm1713_vm7, %v1708_v29, %v1710_v28  ;;  %1789 = vmatprep.mubr.f32.mxu1 %v2776_v2 }
  0xbe   :  { %1826 = vmatprep.subr.mxu0 %v1715_v30  ;;  %v2245_v30 = vld [vmem:[%s3441_s3 + $0x140] sm:$0xff] }
  0xc0   :  { %v1704_v31 = vpop.permute.xlu1 %1703  ;;  %v1706_v32 = vpop.permute.xlu0 %1705 }
  0xc1   :  { %v1716_v34 = vsel %vm1713_vm7, %v1706_v32, %v1708_v29  ;;  %v1717_v35 = vsel %vm1713_vm7, %v1704_v31, %v1706_v32  ;;  %v2224_v29 = vld [vmem:[%s3441_s3 + $0x98] sm:$0xff] }
  0xc2   :  { %1755 = vmatprep.subr.mxu1 %v1717_v35  ;;  %1827 = vmatpush1.msra.mxu0 %v1716_v34  ;;  %v2260_v32 = vld [vmem:[%s3441_s3 + $0x1b8] sm:$0xff]  ;;  %v2207_v35 = vld [vmem:[%s3441_s3 + $0x10] sm:$0xff] }
  0xc3   :  { %2643 = vmatmul.mubr.msk.f32.vlgmr.msra.gmra.mxu0 %vm72_vm1, %v2641_v33  ;;  %v2244_v34 = vld [vmem:[%s3441_s3 + $0x138] sm:$0xff] }
  0xc4   :  { %v1947_v36 = vpop.permute.xlu1 %1946  ;;  %v1702_v37 = vpop.permute.xlu0 %1701  ;;  %2032 = vmatprep.mubr.f32.mxu0 %v2776_v2 }
  0xc5   :  { %v1718_v38 = vsel %vm1713_vm7, %v1702_v37, %v1704_v31  ;;  %v2208_v31 = vld [vmem:[%s3441_s3 + $0x18] sm:$0xff] }
  0xc6   :  { %1756 = vmatpush1.msra.mxu1 %v1718_v38  ;;  %v2243_v38 = vld [vmem:[%s3441_s3 + $0x130] sm:$0xff] }
  0xc7   :  { %2642 = vmatmul.mubr.msk.f32.vlgmr.msra.gmra.mxu1 %vm72_vm1, %v2641_v33 }
  0xc8   :  { %v1945_v39 = vpop.permute.xlu1 %1944  ;;  %v1949_v40 = vpop.permute.xlu0 %1948  ;;  %1931 = vmatprep.mubr.f32.mxu1 %v2776_v2 }
  0xc9   :  { %v1961_v41 = vsel %vm1956_vm8, %v1945_v39, %v1947_v36  ;;  %v1960_v42 = vsel %vm1956_vm8, %v1947_v36, %v1949_v40  ;;  %v2259_v36 = vld [vmem:[%s3441_s3 + $0x1b0] sm:$0xff] }
  0xca   :  { %1998 = vmatprep.subr.mxu0 %v1960_v42  ;;  %v2242_v42 = vld [vmem:[%s3441_s3 + $0x128] sm:$0xff] }
  0xcb   :  { %1999 = vmatpush1.msra.mxu0 %v1961_v41  ;;  %v2221_v41 = vld [vmem:[%s3441_s3 + $0x80] sm:$0xff] }
  0xcc   :  { %v1951_v44 = vpop.permute.xlu1 %1950  ;;  %2646 = vmatmul.mubr.msk.f32.vlgmr.msra.gmra.mxu0 %vm72_vm1, %v2645_v43  ;;  %v1712_v45 = vpop.permute.xlu0 %1711 }
  0xcd   :  { %v1714_v46 = vsel %vm1713_vm7, %v1710_v28, %v1712_v45  ;;  %v1719_v47 = vsel %vm1713_vm7, %v1712_v45, %v1702_v37  ;;  %2174 = vmatprep.mubr.f32.mxu0 %v2776_v2  ;;  %v1959_v53 = vsel %vm1956_vm8, %v1949_v40, %v1951_v44  ;;  %v2261_v28 = vld [vmem:[%s3441_s3 + $0x1c0] sm:$0xff]  ;;  %v2222_v37 = vld [vmem:[%s3441_s3 + $0x88] sm:$0xff] }
  0xce   :  { %1897 = vmatprep.subr.mxu1 %v1719_v47  ;;  %v2258_v40 = vld [vmem:[%s3441_s3 + $0x1a8] sm:$0xff]  ;;  %v2241_v45 = vld [vmem:[%s3441_s3 + $0x120] sm:$0xff]  ;;  %v2256_v47 = vld [vmem:[%s3441_s3 + $0x198] sm:$0xff] }
  0xcf   :  { %1898 = vmatpush1.msra.mxu1 %v1714_v46  ;;  %v2300_v46 = vld [vmem:[%s3441_s3 + $0x2f8] sm:$0xff] }
  0xd0   :  { %v1955_v48 = vpop.permute.xlu1 %1954  ;;  %2644 = vmatmul.mubr.msk.f32.vlgmr.msra.gmra.mxu1 %vm72_vm1, %v2641_v33  ;;  %v1953_v49 = vpop.permute.xlu0 %1952  ;;  %v2223_v33 = vld [vmem:[%s3441_s3 + $0x90] sm:$0xff] }
  0xd1   :  { %v1957_v50 = vsel %vm1956_vm8, %v1953_v49, %v1955_v48  ;;  %v1958_v51 = vsel %vm1956_vm8, %v1951_v44, %v1953_v49  ;;  %v1962_v52 = vsel %vm1956_vm8, %v1955_v48, %v1945_v39  ;;  %2103 = vmatprep.mubr.f32.mxu1 %v2776_v2  ;;  %v2220_v2 = vld [vmem:[%s3441_s3 + $0x78] sm:$0xff]  ;;  %v2206_v39 = vld [vmem:[%s3441_s3 + $0x8] sm:$0xff]  ;;  %v2257_v44 = vld [vmem:[%s3441_s3 + $0x1a0] sm:$0xff] }
  0xd2   :  { %2069 = vmatprep.subr.mxu1 %v1958_v51  ;;  %2140 = vmatprep.subr.mxu0 %v1962_v52  ;;  %v2240_v48 = vld [vmem:[%s3441_s3 + $0x118] sm:$0xff]  ;;  %v2255_v49 = vld [vmem:[%s3441_s3 + $0x190] sm:$0xff]  ;;  %v2254_v51 = vld [vmem:[%s3441_s3 + $0x188] sm:$0xff] }
  0xd3   :  { %2070 = vmatpush1.msra.mxu1 %v1959_v53  ;;  %2141 = vmatpush1.msra.mxu0 %v1957_v50  ;;  %v2239_v50 = vld [vmem:[%s3441_s3 + $0x110] sm:$0xff]  ;;  %v2238_v52 = vld [vmem:[%s3441_s3 + $0x108] sm:$0xff]  ;;  %v2253_v53 = vld [vmem:[%s3441_s3 + $0x180] sm:$0xff] }
  0xd4   :  { %2647 = vmatmul.mubr.msk.f32.vlgmr.msra.gmra.mxu1 %vm72_vm1, %v2645_v43  ;;  %2648 = vmatmul.mubr.msk.f32.vlgmr.msra.gmra.mxu0 %vm72_vm1, %v2645_v43  ;;  %v2205_v43 = vld [vmem:[%s3441_s3] sm:$0xff] }
  0xd5   :  { %2651 = vmatprep.subr.mxu1 %v2236_v54  ;;  %2686 = vmatprep.subr.mxu0 %v2268_v62  ;;  %v2237_v54 = vld [vmem:[%s3441_s3 + $0x100] sm:$0xff] }
  0xd6   :  { %2652 = vmatpush3.msra.mxu1 %v2220_v2  ;;  %2687 = vmatpush3.msra.mxu0 %v2252_v1 }
  0xd7   :  { %2653 = vmatprep.subr.mxu1 %v2235_v10  ;;  %2688 = vmatprep.subr.mxu0 %v2267_v0 }
  0xd8   :  { %2654 = vmatpush3.msra.mxu1 %v2219_v55  ;;  %2689 = vmatpush3.msra.mxu0 %v2251_v8 }
  0xd9   :  { %2655 = vmatprep.subr.mxu1 %v2234_v56  ;;  %2690 = vmatprep.subr.mxu0 %v2266_v9 }
  0xda   :  { %2656 = vmatpush3.msra.mxu1 %v2218_v57  ;;  %2691 = vmatpush3.msra.mxu0 %v2250_v3 }
  0xdb   :  { %2657 = vmatprep.subr.mxu1 %v2233_v58  ;;  %2692 = vmatprep.subr.mxu0 %v2265_v12 }
  0xdc   :  { %2658 = vmatpush3.msra.mxu1 %v2217_v59  ;;  %2693 = vmatpush3.msra.mxu0 %v2249_v14 }
  0xdd   :  { %2659 = vmatprep.subr.mxu1 %v2232_v60  ;;  %2694 = vmatprep.subr.mxu0 %v2264_v16 }
  0xde   :  { %2660 = vmatpush3.msra.mxu1 %v2216_v61  ;;  %2695 = vmatpush3.msra.mxu0 %v2248_v18 }
  0xdf   :  { %2661 = vmatprep.subr.mxu1 %v2231_v63  ;;  %2696 = vmatprep.subr.mxu0 %v2263_v20 }
  0xe0   :  { %2662 = vmatpush3.msra.mxu1 %v2215_v4  ;;  %2697 = vmatpush3.msra.mxu0 %v2247_v22 }
  0xe1   :  { %2663 = vmatprep.subr.mxu1 %v2230_v7  ;;  %2698 = vmatprep.subr.mxu0 %v2262_v24 }
  0xe2   :  { %2664 = vmatpush3.msra.mxu1 %v2214_v5  ;;  %2699 = vmatpush3.msra.mxu0 %v2246_v26 }
  0xe3   :  { %2665 = vmatprep.subr.mxu1 %v2229_v6  ;;  %2700 = vmatprep.subr.mxu0 %v2261_v28 }
  0xe4   :  { %2666 = vmatpush3.msra.mxu1 %v2213_v11  ;;  %2701 = vmatpush3.msra.mxu0 %v2245_v30 }
  0xe5   :  { %2667 = vmatprep.subr.mxu1 %v2228_v13  ;;  %2702 = vmatprep.subr.mxu0 %v2260_v32 }
  0xe6   :  { %2668 = vmatpush3.msra.mxu1 %v2212_v15  ;;  %2703 = vmatpush3.msra.mxu0 %v2244_v34 }
  0xe7   :  { %2669 = vmatprep.subr.mxu1 %v2227_v17  ;;  %2704 = vmatprep.subr.mxu0 %v2259_v36 }
  0xe8   :  { %2670 = vmatpush3.msra.mxu1 %v2211_v19  ;;  %2705 = vmatpush3.msra.mxu0 %v2243_v38 }
  0xe9   :  { %2671 = vmatprep.subr.mxu1 %v2226_v21  ;;  %2706 = vmatprep.subr.mxu0 %v2258_v40 }
  0xea   :  { %2672 = vmatpush3.msra.mxu1 %v2210_v23  ;;  %2707 = vmatpush3.msra.mxu0 %v2242_v42 }
  0xeb   :  { %2673 = vmatprep.subr.mxu1 %v2225_v25  ;;  %2708 = vmatprep.subr.mxu0 %v2257_v44 }
  0xec   :  { %2674 = vmatpush3.msra.mxu1 %v2209_v27  ;;  %2709 = vmatpush3.msra.mxu0 %v2241_v45 }
  0xed   :  { %2675 = vmatprep.subr.mxu1 %v2224_v29  ;;  %2710 = vmatprep.subr.mxu0 %v2256_v47 }
  0xee   :  { %2676 = vmatpush3.msra.mxu1 %v2208_v31  ;;  %2711 = vmatpush3.msra.mxu0 %v2240_v48 }
  0xef   :  { %2677 = vmatprep.subr.mxu1 %v2223_v33  ;;  %2712 = vmatprep.subr.mxu0 %v2255_v49 }
  0xf0   :  { %2678 = vmatpush3.msra.mxu1 %v2207_v35  ;;  %2713 = vmatpush3.msra.mxu0 %v2239_v50 }
  0xf1   :  { %2679 = vmatprep.subr.mxu1 %v2222_v37  ;;  %2714 = vmatprep.subr.mxu0 %v2254_v51 }
  0xf2   :  { %2680 = vmatpush3.msra.mxu1 %v2206_v39  ;;  %2715 = vmatpush3.msra.mxu0 %v2238_v52 }
  0xf3   :  { %2681 = vmatprep.subr.mxu1 %v2221_v41  ;;  %2716 = vmatprep.subr.mxu0 %v2253_v53 }
  0xf4   :  { %2682 = vmatpush3.msra.mxu1 %v2205_v43  ;;  %2717 = vmatpush3.msra.mxu0 %v2237_v54 }
  0xf5   :  { %2721 = vmatprep.subr.mxu1 %v2300_v46 }
 0x13c   :  { %v142_v2 = vpop.f32.mrf.mxu0 }
 0x13e   :  { %v144_v10 = vpop.f32.mrf.mxu0 }
 0x140   :  { %v213_v55 = vpop.f32.mrf.mxu0 }
 0x142   :  { %v215_v56 = vpop.f32.mrf.mxu0 }
 0x144   :  { %v3290_v57 = vpop.f32.mrf.mxu0 }
 0x146   :  { %v286_v58 = vpop.f32.mrf.mxu0 }
 0x148   :  { %v358_v59 = vpop.f32.mrf.mxu0 }
 0x149   :  { %v359_v27 = vadd.f32 %v358_v59, %v142_v2 }
 0x14a   :  { %v360_v60 = vpop.f32.mrf.mxu0 }
 0x14b   :  { %v361_v30 = vadd.f32 %v360_v60, %v144_v10 }
 0x14c   :  { %v429_v61 = vpop.f32.mrf.mxu0 }
 0x14d   :  { %v430_v39 = vadd.f32 %v429_v61, %v213_v55 }
 0x14e   :  { %v431_v62 = vpop.f32.mrf.mxu0 }
 0x14f   :  { %v432_v42 = vadd.f32 %v431_v62, %v215_v56 }
 0x150   :  { %v3292_v63 = vpop.f32.mrf.mxu0 }
 0x152   :  { %v502_v1 = vpop.f32.mrf.mxu0 }
 0x153   :  { %v503_v36 = vadd.f32 %v502_v1, %v286_v58 }
 0x154   :  { %v595_v4 = vpop.f32.mrf.mxu0 }
 0x155   :  { %v742_v31 = vadd.f32 %v595_v4, %v359_v27  ;;  %v3304_v4 = vpop.permute.xlu0 %2190 }
 0x156   :  { %v597_v0 = vpop.f32.mrf.mxu0 }
 0x157   :  { %v743_v33 = vadd.f32 %v597_v0, %v361_v30 }
 0x158   :  { %v3294_v7 = vpop.f32.mrf.mxu0  ;;  %v666_v8 = vpop.f32.mrf.mxu1 }
 0x159   :  { %v744_v44 = vadd.f32 %v666_v8, %v430_v39 }
 0x15a   :  { %v739_v5 = vpop.f32.mrf.mxu0  ;;  %v668_v6 = vpop.f32.mrf.mxu1 }
 0x15b   :  { %v747_v45 = vadd.f32 %v739_v5, %v503_v36  ;;  %v745_v49 = vadd.f32 %v668_v6, %v432_v42  ;;  %v2298_v36 = vld [vmem:[%s3441_s3 + $0x2e8] sm:$0xff]  ;;  %v2297_v42 = vld [vmem:[%s3441_s3 + $0x2e0] sm:$0xff] }
 0x15f   :  { %v909_v9 = vpop.f32.mrf.mxu0 }
 0x160   :  { %v987_v50 = vadd.f32 %v909_v9, %v744_v44  ;;  %v2296_v44 = vld [vmem:[%s3441_s3 + $0x2d8] sm:$0xff] }
 0x161   :  { %v911_v3 = vpop.f32.mrf.mxu0 }
 0x162   :  { %v988_v10 = vadd.f32 %v911_v3, %v745_v49 }
 0x163   :  { %v838_v11 = vpop.f32.mrf.mxu1 }
 0x164   :  { %v1062_v12 = vpop.f32.mrf.mxu0  ;;  %v985_v34 = vadd.f32 %v838_v11, %v742_v31 }
 0x165   :  { %v840_v13 = vpop.f32.mrf.mxu1 }
 0x166   :  { %v1064_v15 = vpop.f32.mrf.mxu0  ;;  %v986_v37 = vadd.f32 %v840_v13, %v743_v33  ;;  %v1209_v40 = vadd.f32 %v1062_v12, %v985_v34  ;;  %v2283_v33 = vld [vmem:[%s3441_s3 + $0x270] sm:$0xff] }
 0x167   :  { %v3296_v14 = vpop.f32.mrf.mxu1 }
 0x168   :  { %v3298_v18 = vpop.f32.mrf.mxu0  ;;  %v1210_v46 = vadd.f32 %v1064_v15, %v986_v37  ;;  %v501_v37 = vadd.f32 %v3292_v63, %v3290_v57  ;;  %v2281_v57 = vld [vmem:[%s3441_s3 + $0x260] sm:$0xff] }
 0x169   :  { %v982_v16 = vpop.f32.mrf.mxu1 }
 0x16a   :  { %v1206_v20 = vpop.f32.mrf.mxu0  ;;  %v990_v51 = vadd.f32 %v982_v16, %v747_v45  ;;  %v746_v45 = vadd.f32 %v3294_v7, %v501_v37  ;;  %v2279_v7 = vld [vmem:[%s3441_s3 + $0x250] sm:$0xff] }
 0x16b   :  { %v1133_v17 = vpop.f32.mrf.mxu1 }
 0x16c   :  { %v1376_v22 = vpop.f32.mrf.mxu0  ;;  %v1211_v58 = vadd.f32 %v1133_v17, %v987_v50  ;;  %v1214_v61 = vadd.f32 %v1206_v20, %v990_v51  ;;  %v989_v49 = vadd.f32 %v3296_v14, %v746_v45  ;;  %v2294_v50 = vld [vmem:[%s3441_s3 + $0x2c8] sm:$0xff]  ;;  %v2293_v14 = vld [vmem:[%s3441_s3 + $0x2c0] sm:$0xff] }
 0x16d   :  { %v1135_v19 = vpop.f32.mrf.mxu1  ;;  %v2278_v51 = vld [vmem:[%s3441_s3 + $0x248] sm:$0xff] }
 0x16e   :  { %v1378_v24 = vpop.f32.mrf.mxu0  ;;  %v1212_v56 = vadd.f32 %v1135_v19, %v988_v10  ;;  %v1454_v8 = vadd.f32 %v1376_v22, %v1211_v58  ;;  %v2284_v22 = vld [vmem:[%s3441_s3 + $0x278] sm:$0xff]  ;;  %v2275_v58 = vld [vmem:[%s3441_s3 + $0x230] sm:$0xff] }
 0x16f   :  { %v1305_v21 = vpop.f32.mrf.mxu1  ;;  %v2276_v10 = vld [vmem:[%s3441_s3 + $0x238] sm:$0xff] }
 0x170   :  { %v1452_v47 = vadd.f32 %v1305_v21, %v1209_v40  ;;  %v1455_v12 = vadd.f32 %v1378_v24, %v1212_v56  ;;  %v2299_v24 = vld [vmem:[%s3441_s3 + $0x2f0] sm:$0xff]  ;;  %v2273_v56 = vld [vmem:[%s3441_s3 + $0x220] sm:$0xff] }
 0x171   :  { %v1307_v23 = vpop.f32.mrf.mxu1 }
 0x172   :  { %v1453_v52 = vadd.f32 %v1307_v23, %v1210_v46  ;;  %v2280_v46 = vld [vmem:[%s3441_s3 + $0x258] sm:$0xff] }
 0x174   :  { %v1548_v26 = vpop.f32.mrf.mxu0 }
 0x175   :  { %v1695_v53 = vadd.f32 %v1548_v26, %v1452_v47 }
 0x176   :  { %v1550_v29 = vpop.f32.mrf.mxu0 }
 0x177   :  { %v1696_v59 = vadd.f32 %v1550_v29, %v1453_v52  ;;  %v1213_v52 = vadd.f32 %v3298_v18, %v989_v49  ;;  %v2291_v18 = vld [vmem:[%s3441_s3 + $0x2b0] sm:$0xff] }
 0x178   :  { %v3300_v25 = vpop.f32.mrf.mxu1 }
 0x17a   :  { %v1449_v28 = vpop.f32.mrf.mxu1 }
 0x17b   :  { %v3302_v32 = vpop.f32.mrf.mxu0  ;;  %v1457_v5 = vadd.f32 %v1449_v28, %v1214_v61 }
 0x17c   :  { %v1619_v35 = vpop.f32.mrf.mxu1 }
 0x17d   :  { %v1692_v38 = vpop.f32.mrf.mxu0  ;;  %v1697_v3 = vadd.f32 %v1619_v35, %v1454_v8  ;;  %v2271_v8 = vld [vmem:[%s3441_s3 + $0x210] sm:$0xff] }
 0x17e   :  { %v1621_v41 = vpop.f32.mrf.mxu1  ;;  %v1700_v16 = vadd.f32 %v1692_v38, %v1457_v5  ;;  %v2282_v38 = vld [vmem:[%s3441_s3 + $0x268] sm:$0xff] }
 0x17f   :  { %v1698_v17 = vadd.f32 %v1621_v41, %v1455_v12  ;;  %v2286_v5 = vld [vmem:[%s3441_s3 + $0x288] sm:$0xff]  ;;  %v2269_v12 = vld [vmem:[%s3441_s3 + $0x200] sm:$0xff] }
 0x183   :  { %v1862_v43 = vpop.f32.mrf.mxu0 }
 0x184   :  { %v1940_v19 = vadd.f32 %v1862_v43, %v1697_v3 }
 0x185   :  { %v1864_v54 = vpop.f32.mrf.mxu0 }
 0x186   :  { %v1941_v27 = vadd.f32 %v1864_v54, %v1698_v17  ;;  %v2292_v54 = vld [vmem:[%s3441_s3 + $0x2b8] sm:$0xff] }
 0x187   :  { %v1791_v48 = vpop.f32.mrf.mxu1 }
 0x188   :  { %v1938_v55 = vadd.f32 %v1791_v48, %v1695_v53  ;;  %v2295_v48 = vld [vmem:[%s3441_s3 + $0x2d0] sm:$0xff]  ;;  %v2277_v53 = vld [vmem:[%s3441_s3 + $0x240] sm:$0xff] }
 0x189   :  { %v1793_v2 = vpop.f32.mrf.mxu1 }
 0x18a   :  { %v1939_v62 = vadd.f32 %v1793_v2, %v1696_v59  ;;  %v1456_v2 = vadd.f32 %v3300_v25, %v1213_v52  ;;  %v2290_v25 = vld [vmem:[%s3441_s3 + $0x2a8] sm:$0xff] }
 0x18c   :  { %v2034_v60 = vpop.f32.mrf.mxu0  ;;  %v1699_v59 = vadd.f32 %v3302_v32, %v1456_v2  ;;  %v2288_v32 = vld [vmem:[%s3441_s3 + $0x298] sm:$0xff] }
 0x18d   :  { %v2181_v1 = vadd.f32 %v2034_v60, %v1938_v55  ;;  %v2274_v55 = vld [vmem:[%s3441_s3 + $0x228] sm:$0xff]  ;;  %v2289_v60 = vld [vmem:[%s3441_s3 + $0x2a0] sm:$0xff] }
 0x18e   :  { %v2036_v0 = vpop.f32.mrf.mxu0 }
 0x18f   :  { %v2182_v9 = vadd.f32 %v2036_v0, %v1939_v62  ;;  %v2193_v11 = vadd.f32 %v3304_v4, %v2181_v1  ;;  %v2272_v1 = vld [vmem:[%s3441_s3 + $0x218] sm:$0xff]  ;;  %v2287_v0 = vld [vmem:[%s3441_s3 + $0x290] sm:$0xff] }
 0x190   :  { %v3306_v6 = vpop.f32.mrf.mxu1 }
 0x191   :  { %v2194_v13 = vadd.f32 %v3304_v4, %v2182_v9  ;;  %v2199_v26 = vmax.f32 %v2193_v11, 0.0  ;;  %v1942_v61 = vadd.f32 %v3306_v6, %v1699_v59  ;;  %v2270_v6 = vld [vmem:[%s3441_s3 + $0x208] sm:$0xff]  ;;  %v2285_v11 = vld [vmem:[%s3441_s3 + $0x280] sm:$0xff] }
 0x192   :  { %v1935_v15 = vpop.f32.mrf.mxu1 }
 0x193   :  { %v2200_v20 = vmax.f32 %v2194_v13, 0.0  ;;  %v1943_v28 = vadd.f32 %v1935_v15, %v1700_v16  ;;  %v2513_v13 = vld [vmem:[%s3443_s5] sm:$0xff]  ;;  %v2514_v15 = vld [vmem:[%s3443_s5 + $0x8] sm:$0x3] }
 0x194   :  { %v2105_v21 = vpop.f32.mrf.mxu1  ;;  %v3310_v23 = vpop.f32.mrf.mxu0  ;;  %2517 = vperm.xlu1 %2775, %v2513_v13  }
 0x195   :  { %v2183_v29 = vadd.f32 %v2105_v21, %v1940_v19  ;;  %2365 = vmatprep.mubr.f32.mxu1 %v2200_v20  ;;  %v2185_v62 = vadd.f32 %v3310_v23, %v1942_v61 }
 0x196   :  { %v2107_v30 = vpop.f32.mrf.mxu1  ;;  %v2178_v31 = vpop.f32.mrf.mxu0  ;;  %2366 = vmatmul.mubr.f32.vlgmr.msra.gmra.mxu1 %v2199_v26 }
 0x197   :  { %v2184_v34 = vadd.f32 %v2107_v30, %v1941_v27  ;;  %v2186_v35 = vadd.f32 %v2178_v31, %v1943_v28  ;;  %2722 = vmatpush3.msra.mxu1 %v2284_v22  ;;  %v2195_v39 = vadd.f32 %v3304_v4, %v2183_v29  ;;  %v2197_v9 = vadd.f32 %v3304_v4, %v2185_v62 }
 0x198   :  { %2723 = vmatprep.subr.mxu1 %v2299_v24  ;;  %2522 = vperm.xlu1 %2775, %v2514_v15   ;;  %v2512_v24 = vld [vmem:[%s3442_s4 + $0x8] sm:$0x3] }
 0x199   :  { %v2196_v40 = vadd.f32 %v3304_v4, %v2184_v34  ;;  %v2198_v41 = vadd.f32 %v3304_v4, %v2186_v35  ;;  %2724 = vmatpush3.msra.mxu1 %v2283_v33  ;;  %v2201_v47 = vmax.f32 %v2195_v39, 0.0  ;;  %v2203_v3 = vmax.f32 %v2197_v9, 0.0  ;;  %v2511_v4 = vld [vmem:[%s3442_s4] sm:$0xff] }
 0x19a   :  { %2725 = vmatprep.subr.mxu1 %v2298_v36 }
 0x19b   :  { %v2202_v63 = vmax.f32 %v2196_v40, 0.0  ;;  %v2204_v43 = vmax.f32 %v2198_v41, 0.0  ;;  %2726 = vmatpush3.msra.mxu1 %v2282_v38 }
 0x19c   :  { %2727 = vmatprep.subr.mxu1 %v2297_v42 }
 0x19d   :  { %2728 = vmatpush3.msra.mxu1 %v2281_v57  ;;  %2435 = vmatprep.mubr.f32.mxu0 %v2202_v63 }
 0x19e   :  { %2729 = vmatprep.subr.mxu1 %v2296_v44  ;;  %2505 = vmatprep.mubr.f32.mxu1 %v2204_v43 }
 0x19f   :  { %2436 = vmatmul.mubr.f32.vlgmr.msra.gmra.mxu0 %v2201_v47  ;;  %2730 = vmatpush3.msra.mxu1 %v2280_v46 }
 0x1a0   :  { %2731 = vmatprep.subr.mxu1 %v2295_v48  ;;  %2761 = vmatprep.mubr.msk.f32.mxu0 %vm72_vm1, %v2511_v4 }
 0x1a1   :  { %2732 = vmatpush3.msra.mxu1 %v2279_v7 }
 0x1a2   :  { %2733 = vmatprep.subr.mxu1 %v2294_v50 }
 0x1a3   :  { %2734 = vmatpush3.msra.mxu1 %v2278_v51 }
 0x1a4   :  { %2735 = vmatprep.subr.mxu1 %v2293_v14 }
 0x1a5   :  { %2736 = vmatpush3.msra.mxu1 %v2277_v53 }
 0x1a6   :  { %2737 = vmatprep.subr.mxu1 %v2292_v54 }
 0x1a7   :  { %2738 = vmatpush3.msra.mxu1 %v2276_v10 }
 0x1a8   :  { %2739 = vmatprep.subr.mxu1 %v2291_v18 }
 0x1a9   :  { %2740 = vmatpush3.msra.mxu1 %v2275_v58 }
 0x1aa   :  { %2741 = vmatprep.subr.mxu1 %v2290_v25 }
 0x1ab   :  { %2742 = vmatpush3.msra.mxu1 %v2274_v55 }
 0x1ac   :  { %2743 = vmatprep.subr.mxu1 %v2289_v60 }
 0x1ad   :  { %2744 = vmatpush3.msra.mxu1 %v2273_v56 }
 0x1ae   :  { %2745 = vmatprep.subr.mxu1 %v2288_v32 }
 0x1af   :  { %2746 = vmatpush3.msra.mxu1 %v2272_v1 }
 0x1b0   :  { %2747 = vmatprep.subr.mxu1 %v2287_v0 }
 0x1b1   :  { %2748 = vmatpush3.msra.mxu1 %v2271_v8 }
 0x1b2   :  { %2749 = vmatprep.subr.mxu1 %v2286_v5 }
 0x1b3   :  { %2750 = vmatpush3.msra.mxu1 %v2270_v6 }
 0x1b4   :  { %2751 = vmatprep.subr.mxu1 %v2285_v11 }
 0x1b5   :  { %2752 = vmatpush3.msra.mxu1 %v2269_v12 }
 0x1b6   :  { %2506 = vmatmul.mubr.f32.vlgmr.msra.gmra.mxu1 %v2203_v3 }
 0x20f   :  { %v2518_v30 = vpop.permute.xlu1 %2517 }
 0x213   :  { %v2523_v33 = vpop.permute.xlu1 %2522 }
 0x256   :  { %v2683_v17 = vpop.f32.mrf.mxu1 }
 0x258   :  { %v2684_v20 = vpop.f32.mrf.mxu1 }
 0x259   :  { %v2685_v26 = vadd.f32 %v2684_v20, %v2683_v17 }
 0x25f   :  { %v2718_v16 = vpop.f32.mrf.mxu0 }
 0x261   :  { %v2719_v19 = vpop.f32.mrf.mxu0 }
 0x262   :  { %v2720_v21 = vadd.f32 %v2719_v19, %v2718_v16 }
 0x264   :  { %v2438_v27 = vadd.f32 %v2720_v21, %v2685_v26 }
 0x276   :  { %v2753_v23 = vpop.f32.mrf.mxu1 }
 0x278   :  { %v2754_v22 = vpop.f32.mrf.mxu1 }
 0x279   :  { %v2755_v28 = vadd.f32 %v2754_v22, %v2753_v23 }
 0x27b   :  { %v2508_v29 = vadd.f32 %v2755_v28, %v2438_v27 }
 0x27d   :  { %2759 = vmatprep.subr.mxu0 %v2508_v29 }
 0x27e   :  { %2760 = vmatpush3.msra.mxu0 %v2508_v29 }
 0x27f   :  { %2762 = vmatmul.mubr.msk.f32.vlgmr.msra.gmra.mxu0 %vm72_vm1, %v2512_v24 }
 0x33f   :  { %v2763_v31 = vpop.f32.mrf.mxu0 }
 0x340   :  { %v2603_v34 = vadd.f32 %v2763_v31, %v2523_v33 }
 0x341   :  { %v2597_v35 = vpop.f32.mrf.mxu0 }
 0x342   :  { %2609 = vst.msk [vmem:[%s3444_s6 + $0x8] sm:$0x3] %vm2608_vm9, %v2603_v34  ;;  %v2598_v36 = vadd.f32 %v2597_v35, %v2518_v30 }
 0x344   :  { %2607 = vst.msk [vmem:[%s3444_s6] sm:$0xff] %vm2606_vm10, %v2598_v36 }

</bundles_post_ra>
